<compile_context>
chip_gen: v7x
topology: tpu7x:2x2x1
jax: 0.10.0
libtpu: 0.0.40
codegen_flags: <defaults>
</compile_context>

<pallas_src>
import jax
import jax.numpy as jnp
from jax.experimental import pallas as pl
from jax.experimental.pallas import tpu as pltpu

_VMEM_LIMIT_CACHE = None


def _vmem_limit_bytes():
    """Scoped-VMEM hint derived per generation (~32 MiB on v7x, ~64 MiB on v5e/v6e)."""
    global _VMEM_LIMIT_CACHE
    if _VMEM_LIMIT_CACHE is None:
        phys = 128 * 1024 * 1024
        try:
            info = pltpu.get_tpu_info()
            phys = int(getattr(info, "vmem_capacity_bytes", phys) or phys)
        except Exception:
            pass
        _VMEM_LIMIT_CACHE = int(min(phys // 2, 64 * 1024 * 1024))
    return _VMEM_LIMIT_CACHE


# --------------------------------------------------------------------------
# tiling helpers
# --------------------------------------------------------------------------

def _largest_divisor_leq(n, cap):
    cap = max(1, min(n, cap))
    for d in range(cap, 0, -1):
        if n % d == 0:
            return d
    return n


def _row_tile(total_rows, cap):
    """Largest multiple of 8 dividing total_rows and <= cap (else total_rows = full dim,
    which is always a legal block extent)."""
    if total_rows <= cap:
        return total_rows
    d = (cap // 8) * 8
    while d >= 8:
        if total_rows % d == 0:
            return d
        d -= 8
    return total_rows


def _conv_row_tile(H, W, Cin, Cout, pf, vmem_limit):
    """Pick th | H so the per-step VMEM footprint fits the budget and th*W feeds the MXU."""
    budget = max(vmem_limit // 3, 2 << 20)

    def step_bytes(th):
        acc = th * W * Cout * 4                       # f32 accumulator scratch
        xpad = (th + 2) * (W + 2) * Cin * 2           # bf16 padded tile scratch
        xin = 2 * (pf * th) * (pf * W) * Cin * 2      # double-buffered body block
        xout = 2 * th * W * Cout * 2                  # double-buffered output block
        halo = 2 * pf * (pf * W) * Cin * 2            # halo buffers
        wts = 2 * (9 * Cin * Cout * 2 + Cout * 4)     # double-buffered resident weights
        return acc + xpad + xin + xout + halo + wts

    divs = [d for d in range(1, H + 1) if H % d == 0]
    fitting = [d for d in divs if step_bytes(d) <= budget] or [divs[0]]
    for d in fitting:                                  # smallest tile with >=1024 MXU rows
        if d * W >= 1024:
            return d
    return fitting[-1]                                 # else largest that fits


def _lane_dense_2d(x, target=512, cap=16384):
    """Flatten trailing dims so the minor dim is a lane-dense multiple of 128 (>=target
    when cheaply reachable).  Used for the mem-bound MSE reduction."""
    dims = x.shape
    if not dims:
        return x.reshape(1, 1)
    K = dims[-1]
    i = len(dims) - 1
    while i > 0 and (K % 128 != 0 or K < target) and K * dims[i - 1] <= cap:
        i -= 1
        K *= dims[i]
    return x.reshape(x.size // K, K)


# --------------------------------------------------------------------------
# fused (maxpool) + pad + conv3x3 + bias + ReLU kernel, row-tiled with halo
# --------------------------------------------------------------------------

def _make_conv_kernel(pool_first: bool):
    pf = 2 if pool_first else 1

    def kernel(x_body_ref, x_any_ref, w_ref, b_ref, o_ref,
               hbuf_ref, xpad_ref, acc_ref, sem_ref):
        # x_body_ref: (1, pf*TH, pf*W, Cin) bf16  auto-pipelined body row tile
        # x_any_ref : (N, pf*H, pf*W, Cin)  bf16  same array, raw HBM ref (halo rows)
        # w_ref     : (9*Cin, Cout) bf16          fused-tap weights (resident)
        # b_ref     : (1, Cout)  f32
        # o_ref     : (1, TH, W, Cout) bf16
        # hbuf_ref  : (2, pf, pf*W, Cin) bf16 scratch   top/bottom halo row groups
        # xpad_ref  : (TH+2, W+2, Cin)  bf16 scratch    pooled + zero-padded tile
        # acc_ref   : (TH*W, Cout)      f32  scratch    tap-matmul accumulator
        # sem_ref   : DMA semaphores (2,)
        n = pl.program_id(0)
        t = pl.program_id(1)
        nt = pl.num_programs(1)

        TH = o_ref.shape[1]
        W = o_ref.shape[2]
        Cout = o_ref.shape[3]
        Cin = xpad_ref.shape[2]
        Win = pf * W

        def halo_copy(slot, src_row):
            return pltpu.make_async_copy(
                x_any_ref.at[n, pl.ds(src_row, pf)], hbuf_ref.at[slot],
                sem_ref.at[slot])

        # ---- kick off halo DMAs; they overlap with the body pooling/copy below.
        @pl.when(t > 0)
        def _():
            halo_copy(0, t * pf * TH - pf).start()

        @pl.when(t < nt - 1)
        def _():
            halo_copy(1, (t + 1) * pf * TH).start()

        # Image-boundary halos are zero (conv zero padding); only at the edges.
        @pl.when(t == 0)
        def _():
            hbuf_ref[0, :, :, :] = jnp.zeros((pf, Win, Cin), hbuf_ref.dtype)

        @pl.when(t == nt - 1)
        def _():
            hbuf_ref[1, :, :, :] = jnp.zeros((pf, Win, Cin), hbuf_ref.dtype)

        def pool(v, rows_out):
            # (pf*rows_out, pf*W, Cin) -> (rows_out, W, Cin); fused 2x2/stride-2 maxpool
            # stays in bf16 (max is exact).
            if pool_first:
                v = jnp.max(v.reshape(pf * rows_out, W, 2, Cin), axis=2)   # pool W
                v = jnp.max(v.reshape(rows_out, 2, W, Cin), axis=1)        # pool H
            return v

        # ---- zero only the thin left/right border columns (interior is overwritten).
        xpad_ref[:, 0:1, :] = jnp.zeros((TH + 2, 1, Cin), xpad_ref.dtype)
        xpad_ref[:, W + 1:W + 2, :] = jnp.zeros((TH + 2, 1, Cin), xpad_ref.dtype)

        # ---- body tile (pool fused, bf16 end-to-end).
        xpad_ref[1:TH + 1, 1:W + 1, :] = pool(x_body_ref[0], TH)

        # ---- wait for halos, pool, write the padded top/bottom rows.
        @pl.when(t > 0)
        def _():
            halo_copy(0, t * pf * TH - pf).wait()

        @pl.when(t < nt - 1)
        def _():
            halo_copy(1, (t + 1) * pf * TH).wait()

        xpad_ref[0:1, 1:W + 1, :] = pool(hbuf_ref[0], 1)
        xpad_ref[TH + 1:TH + 2, 1:W + 1, :] = pool(hbuf_ref[1], 1)

        # ---- 9 accumulated tap matmuls (bf16 operands, f32 MXU accumulation).
        first = True
        for dy in range(3):
            for dx in range(3):
                k = 3 * dy + dx
                lhs = xpad_ref[dy:dy + TH, dx:dx + W, :].reshape(TH * W, Cin)
                part = jnp.dot(lhs, w_ref[k * Cin:(k + 1) * Cin, :],
                               preferred_element_type=jnp.float32)
                if first:
                    acc_ref[...] = part
                    first = False
                else:
                    acc_ref[...] += part

        out = jnp.maximum(acc_ref[...] + b_ref[...], 0.0)        # bias + fused ReLU
        # TODO(synk): Cout=64 stores are half-lane masked; a lane-dense (TH, W*Cout)
        # store layout would need a minor-dim relayout reshape (skipped, see header).
        o_ref[...] = out.reshape(1, TH, W, Cout).astype(o_ref.dtype)

    return kernel


def conv3x3_relu(x, w9, b2, *, pool_first=False, row_tile=None):
    """3x3 'same' conv + bias + ReLU, optionally preceded by a fused 2x2 maxpool.

    x  : (N, Hin, Win, Cin) bf16 NHWC feature map
    w9 : (9*Cin, Cout) bf16 ; b2 : (1, Cout) f32
    """
    N, Hin, Win, Cin = x.shape
    pf = 2 if pool_first else 1
    H, W = Hin // pf, Win // pf
    Cout = w9.shape[1]
    vmem_limit = _vmem_limit_bytes()
    if row_tile is None:
        th = _conv_row_tile(H, W, Cin, Cout, pf, vmem_limit)
    else:
        th = _largest_divisor_leq(H, row_tile)
    nt = H // th

    return pl.pallas_call(
        _make_conv_kernel(pool_first),
        out_shape=jax.ShapeDtypeStruct((N, H, W, Cout), jnp.bfloat16),
        grid=(N, nt),
        in_specs=[
            pl.BlockSpec((1, pf * th, Win, Cin), lambda n, t: (n, t, 0, 0)),
            pl.BlockSpec(memory_space=pl.ANY),                    # halo rows (manual DMA)
            pl.BlockSpec((9 * Cin, Cout), lambda n, t: (0, 0)),   # resident weights
            pl.BlockSpec((1, Cout), lambda n, t: (0, 0)),         # resident bias
        ],
        out_specs=pl.BlockSpec((1, th, W, Cout), lambda n, t: (n, t, 0, 0)),
        scratch_shapes=[
            pltpu.VMEM((2, pf, Win, Cin), jnp.bfloat16),          # halo buffers
            pltpu.VMEM((th + 2, W + 2, Cin), jnp.bfloat16),       # padded tile (bf16)
            pltpu.VMEM((th * W, Cout), jnp.float32),              # tap accumulator
            pltpu.SemaphoreType.DMA((2,)),
        ],
        compiler_params=pltpu.CompilerParams(
            dimension_semantics=("parallel", "parallel"),
            vmem_limit_bytes=vmem_limit),
    )(x, x, w9, b2)


# --------------------------------------------------------------------------
# conv1_1 special path: im2col in XLA (Cin=3), row-tiled matmul in Pallas
# --------------------------------------------------------------------------

def _matmul_bias_relu_kernel(x_ref, w_ref, b_ref, o_ref):
    acc = jnp.dot(x_ref[...], w_ref[...], preferred_element_type=jnp.float32)
    o_ref[...] = jnp.maximum(acc + b_ref[...], 0.0).astype(o_ref.dtype)


def conv3x3_relu_rgb(x, w9, b2, *, row_tile=2048):
    """conv1_1: a 3-channel minor dim wastes 125/128 VMEM lanes and gives K=3 MXU
    matmuls, so build the (N*H*W, 27) im2col in XLA and run one big row-tiled matmul."""
    N, H, W, Cin = x.shape
    Cout = w9.shape[1]
    xp = jnp.pad(x, ((0, 0), (1, 1), (1, 1), (0, 0)))
    cols = [xp[:, dy:dy + H, dx:dx + W, :] for dy in range(3) for dx in range(3)]
    rows = jnp.concatenate(cols, axis=-1).reshape(N * H * W, 9 * Cin)
    rows = rows.astype(jnp.bfloat16)
    tr = _row_tile(N * H * W, row_tile)
    out = pl.pallas_call(
        _matmul_bias_relu_kernel,
        out_shape=jax.ShapeDtypeStruct((N * H * W, Cout), jnp.bfloat16),
        grid=(N * H * W // tr,),
        in_specs=[
            pl.BlockSpec((tr, 9 * Cin), lambda i: (i, 0)),
            pl.BlockSpec((9 * Cin, Cout), lambda i: (0, 0)),
            pl.BlockSpec((1, Cout), lambda i: (0, 0)),
        ],
        out_specs=pl.BlockSpec((tr, Cout), lambda i: (i, 0)),
        compiler_params=pltpu.CompilerParams(
            dimension_semantics=("parallel",),
            vmem_limit_bytes=_vmem_limit_bytes()),
    )(rows, w9, b2)
    return out.reshape(N, H, W, Cout)


# --------------------------------------------------------------------------
# Gram matrix: tiled reduction over H*W, f32 (C, C) VMEM accumulator
# --------------------------------------------------------------------------

def gram_matrix(x, *, chunk=1024):
    """Per-sample Gram matrix of NHWC features, normalized by C*H*W.
    TODO(synk): normalization convention assumed (reference StyleLoss not provided)."""
    N, H, W, C = x.shape
    HW = H * W
    f = x.reshape(N, HW, C)
    cap_rows = max(8, (1 << 20) // max(1, C * x.dtype.itemsize))
    tk = _row_tile(HW, min(chunk, cap_rows))
    nk = HW // tk
    scale = 1.0 / float(C * HW)

    def kernel(x_ref, o_ref, acc_ref):
        k = pl.program_id(1)

        @pl.when(k == 0)
        def _():
            acc_ref[...] = jnp.zeros(acc_ref.shape, acc_ref.dtype)

        fb = x_ref[0]                                            # (tk, C) bf16
        acc_ref[...] += jax.lax.dot_general(
            fb, fb, (((0,), (0,)), ((), ())),
            preferred_element_type=jnp.float32)                  # f^T @ f

        @pl.when(k == pl.num_programs(1) - 1)
        def _():
            o_ref[...] = (acc_ref[...] * scale)[None]

    return pl.pallas_call(
        kernel,
        out_shape=jax.ShapeDtypeStruct((N, C, C), jnp.float32),
        grid=(N, nk),
        in_specs=[pl.BlockSpec((1, tk, C), lambda n, k: (n, k, 0))],
        out_specs=pl.BlockSpec((1, C, C), lambda n, k: (n, 0, 0)),
        scratch_shapes=[pltpu.VMEM((C, C), jnp.float32)],
        compiler_params=pltpu.CompilerParams(
            dimension_semantics=("parallel", "arbitrary"),
            vmem_limit_bytes=_vmem_limit_bytes()),
    )(f)


# --------------------------------------------------------------------------
# MSE: lane-dense streaming reduction, per-lane f32 vector accumulator
# --------------------------------------------------------------------------

def _mse_kernel(x_ref, t_ref, o_ref):
    i = pl.program_id(1)

    @pl.when(i == 0)
    def _():
        o_ref[...] = jnp.zeros(o_ref.shape, o_ref.dtype)

    d = x_ref[...].astype(jnp.float32) - t_ref[...].astype(jnp.float32)
    o_ref[...] += jnp.sum(d * d, axis=0, keepdims=True)[None]   # (1, 1, K)


def mean_squared_error(x, t):
    """Elementwise MSE between two same-shaped arrays.

    Lane-dense blocks (minor dim a multiple of 128), ~1 MiB per input block, per-lane
    f32 vector accumulators (precision), and an optional leading parallel axis of 2
    partial accumulators so the mem-bound reduction can shard across v7x's two cores."""
    assert x.shape == t.shape
    x2 = _lane_dense_2d(x)
    t2 = _lane_dense_2d(t)
    R, K = x2.shape
    bytes_per_row = max(1, K * x2.dtype.itemsize)
    tr = _row_tile(R, max(8, (1 << 20) // bytes_per_row))
    nb_total = R // tr
    P = 2 if (nb_total % 2 == 0 and nb_total >= 2) else 1
    nb = nb_total // P

    out = pl.pallas_call(
        _mse_kernel,
        out_shape=jax.ShapeDtypeStruct((P, 1, K), jnp.float32),
        grid=(P, nb),
        in_specs=[
            pl.BlockSpec((tr, K), lambda p, i: (p * nb + i, 0)),
            pl.BlockSpec((tr, K), lambda p, i: (p * nb + i, 0)),
        ],
        out_specs=pl.BlockSpec((1, 1, K), lambda p, i: (p, 0, 0)),
        compiler_params=pltpu.CompilerParams(
            dimension_semantics=("parallel", "arbitrary"),
            vmem_limit_bytes=_vmem_limit_bytes()),
    )(x2, t2)
    return jnp.sum(out) / float(x.size)


# --------------------------------------------------------------------------
# Deterministic synthetic "VGG16" parameters (same shapes as torchvision vgg16
# features[0..15]).  TODO(synk): real use would load pretrained weights.
# --------------------------------------------------------------------------

_VGG_LAYERS = {
    "conv1_1": (3, 64),
    "conv1_2": (64, 64),
    "conv2_1": (64, 128),
    "conv2_2": (128, 128),
    "conv3_1": (128, 256),
    "conv3_2": (256, 256),
    "conv3_3": (256, 256),
}


def init_vgg_params(key):
    params = {}
    for i, (name, (cin, cout)) in enumerate(_VGG_LAYERS.items()):
        kw, kb = jax.random.split(jax.random.fold_in(key, i))
        std = (2.0 / (9.0 * cin)) ** 0.5
        w = jax.random.normal(kw, (3, 3, cin, cout), jnp.float32) * std
        b = jax.random.normal(kb, (cout,), jnp.float32) * 0.01
        params[name] = (
            w.reshape(9 * cin, cout).astype(jnp.bfloat16),   # fused-tap MXU matrix
            b.reshape(1, cout).astype(jnp.float32),
        )
    return params


# --------------------------------------------------------------------------
# Module
# --------------------------------------------------------------------------

class FixedPerceptualAndStyleLoss:
    PERCEPTUAL_STEPS = ("conv1_1", "conv1_2", "conv2_2", "conv3_3")
    STYLE_STEPS = ("conv3_3",)

    def __init__(self, perceptual_target, style_target, param_key,
                 perceptual_mask=None, style_mask=None):
        self.params = init_vgg_params(param_key)
        self.perceptual_target = perceptual_target   # NCHW, like the PyTorch module
        self.style_target = style_target
        # TODO(synk): masks (F.interpolate nearest + masked loss) not implemented;
        # this instance uses mask=None, matching the default arguments.
        self.perceptual_mask = perceptual_mask
        self.style_mask = style_mask
        self._built = False

    # ---- VGG truncated feature extractor (heavy ops in Pallas, bf16 feature maps) ----
    def _features(self, x_nchw):
        x = jnp.transpose(x_nchw, (0, 2, 3, 1)).astype(jnp.float32)  # NCHW -> NHWC
        p = self.params
        feats = {}
        x = conv3x3_relu_rgb(x, *p["conv1_1"]); feats["conv1_1"] = x
        x = conv3x3_relu(x, *p["conv1_2"]); feats["conv1_2"] = x
        x = conv3x3_relu(x, *p["conv2_1"], pool_first=True)          # fused maxpool
        x = conv3x3_relu(x, *p["conv2_2"]); feats["conv2_2"] = x
        x = conv3x3_relu(x, *p["conv3_1"], pool_first=True)          # fused maxpool
        x = conv3x3_relu(x, *p["conv3_2"])
        x = conv3x3_relu(x, *p["conv3_3"]); feats["conv3_3"] = x
        return feats

    def build_style_and_perceptual_losses(self):
        pf = self._features(self.perceptual_target)
        sf = self._features(self.style_target)
        self._perceptual_targets = {k: pf[k] for k in self.PERCEPTUAL_STEPS}
        self._style_target_grams = {k: gram_matrix(sf[k]) for k in self.STYLE_STEPS}
        self._built = True

    def __call__(self, generated_image):
        # generated_image: (N, 3, H, W) like the PyTorch forward.
        if not self._built:
            self.build_style_and_perceptual_losses()
        feats = self._features(generated_image)
        style_losses = []
        perceptual_losses = []
        # TODO(synk): the perceptual SSE could be fused into the conv epilogue to save
        # one feature-map HBM read per loss layer; kept modular here.
        for name in ("conv1_1", "conv1_2", "conv2_2", "conv3_3"):
            if name in self.PERCEPTUAL_STEPS:
                perceptual_losses.append(
                    mean_squared_error(feats[name], self._perceptual_targets[name]))
            if name in self.STYLE_STEPS:
                g = gram_matrix(feats[name])
                style_losses.append(
                    mean_squared_error(g, self._style_target_grams[name]))
        return sum(style_losses), sum(perceptual_losses)


# --------------------------------------------------------------------------
# Demo
# --------------------------------------------------------------------------

if __name__ == "__main__":
    key = jax.random.PRNGKey(0)
    k_p, k_s, k_g, k_w = jax.random.split(key, 4)

    N, C, H, W = 2, 3, 16, 16  # small NCHW images (VGG expects 3 channels)
    perceptual_target = jax.random.uniform(k_p, (N, C, H, W), jnp.float32)
    style_target = jax.random.uniform(k_s, (N, C, H, W), jnp.float32)
    generated_image = jax.random.uniform(k_g, (N, C, H, W), jnp.float32)

    loss_module = FixedPerceptualAndStyleLoss(perceptual_target, style_target, k_w)
    style_loss, perceptual_loss = loss_module(generated_image)
    jax.block_until_ready((style_loss, perceptual_loss))
    print("KERNEL_OK")
</pallas_src>

<mosaic_0001>
module attributes {stable_mosaic.version = 11 : i64} {
  func.func @_matmul_bias_relu_kernel(%arg0: i32, %arg1: memref<512x27xbf16, #tpu.memory_space<vmem>>, %arg2: memref<27x64xbf16, #tpu.memory_space<vmem>>, %arg3: memref<1x64xf32, #tpu.memory_space<vmem>>, %arg4: memref<512x64xbf16, #tpu.memory_space<vmem>>) attributes {dimension_semantics = [#tpu.dimension_semantics<parallel>], iteration_bounds = array<i64: 1>, scalar_prefetch = 0 : i64, scratch_operands = 0 : i64, tpu.core_type = #tpu.core_type<tc>, window_params = [{transform_indices = @transform_0, window_bounds = array<i64: 512, 27>}, {pipeline_mode = #tpu.pipeline_mode<synchronous>, transform_indices = @transform_1, window_bounds = array<i64: 27, 64>}, {pipeline_mode = #tpu.pipeline_mode<synchronous>, transform_indices = @transform_2, window_bounds = array<i64: 1, 64>}, {transform_indices = @transform_3, window_bounds = array<i64: 512, 64>}]} {
    %c0 = arith.constant 0 : index
    %c0_0 = arith.constant 0 : index
    %0 = vector.load %arg1[%c0, %c0_0] : memref<512x27xbf16, #tpu.memory_space<vmem>>, vector<512x27xbf16>
    %c0_1 = arith.constant 0 : index
    %c0_2 = arith.constant 0 : index
    %1 = vector.load %arg2[%c0_1, %c0_2] : memref<27x64xbf16, #tpu.memory_space<vmem>>, vector<27x64xbf16>
    %cst = arith.constant dense<0.000000e+00> : vector<512x64xf32>
    %2 = tpu.matmul %0, %1, %cst {dimension_numbers = #tpu.dot_dimension_numbers<[1], [0], [0], [1], [0, 0, 1, 1], [], []>} : vector<512x27xbf16>, vector<27x64xbf16>, vector<512x64xf32> -> vector<512x64xf32>
    %c0_3 = arith.constant 0 : index
    %c0_4 = arith.constant 0 : index
    %3 = vector.load %arg3[%c0_3, %c0_4] : memref<1x64xf32, #tpu.memory_space<vmem>>, vector<1x64xf32>
    %4 = vector.broadcast %3 : vector<1x64xf32> to vector<512x64xf32>
    %5 = arith.addf %2, %4 : vector<512x64xf32>
    %cst_5 = arith.constant 0.000000e+00 : f32
    %6 = vector.broadcast %cst_5 : f32 to vector<512x64xf32>
    %7 = arith.maximumf %5, %6 : vector<512x64xf32>
    %8 = arith.truncf %7 : vector<512x64xf32> to vector<512x64xbf16>
    %c0_6 = arith.constant 0 : index
    %c0_7 = arith.constant 0 : index
    %9 = vector.load %arg4[%c0_6, %c0_7] : memref<512x64xbf16, #tpu.memory_space<vmem>>, vector<512x64xbf16>
    tpu.vector_store %arg4[%c0_6, %c0_7], %8 {strides = array<i32>} : memref<512x64xbf16, #tpu.memory_space<vmem>>, vector<512x64xbf16>,
    return
  }
  func.func @transform_0(%arg0: i32) -> (i32, i32) {
    %c0_i32 = arith.constant 0 : i32
    %c0_i32_0 = arith.constant 0 : i32
    return %arg0, %c0_i32 : i32, i32
  }
  func.func @transform_1(%arg0: i32) -> (i32, i32) {
    %c0_i32 = arith.constant 0 : i32
    %c0_i32_0 = arith.constant 0 : i32
    %c0_i32_1 = arith.constant 0 : i32
    return %c0_i32, %c0_i32_0 : i32, i32
  }
  func.func @transform_2(%arg0: i32) -> (i32, i32) {
    %c0_i32 = arith.constant 0 : i32
    %c0_i32_0 = arith.constant 0 : i32
    %c0_i32_1 = arith.constant 0 : i32
    return %c0_i32, %c0_i32_0 : i32, i32
  }
  func.func @transform_3(%arg0: i32) -> (i32, i32) {
    %c0_i32 = arith.constant 0 : i32
    %c0_i32_0 = arith.constant 0 : i32
    return %arg0, %c0_i32 : i32, i32
  }
}

</mosaic_0001>

<bundles_post_ra>
// kernel: tpu_custom_call.1
= control target key start
LH: loop header
LB: loop body
LE: loop exit
PB: predicated region body
PF: predicated region fallthrough
CT: control target
= control target key end

     0   :  { %8 = vsyncpa [#allocation3], 0  ;;  %s1786_s0 = inlined_call_operand.hbm [shape: bf16[512,27], index: 0, kind: input, shape index: {}]   ;;  %s1787_s1 = inlined_call_operand.hbm [shape: bf16[27,64], index: 1, kind: input, shape index: {}]   ;;  %s1788_s2 = inlined_call_operand.hbm [shape: f32[1,64], index: 2, kind: input, shape index: {}]   ;;  %s1789_s3 = inlined_call_operand.hbm [shape: bf16[512,64], index: 3, kind: output, shape index: {}]  }
   0x1   :  { %9 = vsyncpa [#allocation6], 0 }
   0x2   :  { %10 = vsyncpa [#allocation4], 0  ;;  %s1533_s12 = smov [#allocation5]   ;;  %s1534_s14 = smov [#allocation2]  }
   0x3   :  { %s28_s13 = sshll.u32 %s1533_s12, 4  ;;  %s16_s15 = sshll.u32 %s1534_s14, 4  ;;  %s29_s13 = int_to_ptr.vmem [resolvable:$true] %s28_s13  ;;  %s1560_s15 = int_to_ptr.vmem [resolvable:$true] %s16_s15 }
   0x4   :  { %s1439_s18 = scalar_lea.hbm %s1787_s1, 256 }
   0x5   :  { %p1440_p0 = scmp.ne.s32.totalorder %s1787_s1, %s1439_s18  ;;  %p1443_p1 = scmp.lt.u32.totalorder %s1439_s18, %s1787_s1 }
   0x7   :  { %p1445_p2 = pnand %p1443_p1, %p1440_p0 }
   0x9   :  { %1448 = shalt.err (!%p1445_p2)
}
   0xa   :  { %s1449_s23 = scalar_lea.vmem %s29_s13, 256  ;;  %p1454_p4 = scmp.lt.s32.totalorder %s29_s13, %s29_s13 }
   0xb   :  { %p1450_p3 = scmp.ne.s32.totalorder %s29_s13, %s1449_s23  ;;  %p1455_p5 = scmp.lt.s32.totalorder %s1449_s23, %s1449_s23 }
   0xd   :  { %p1456_p6 = por %p1455_p5, %p1454_p4 }
   0xf   :  { %p1457_p7 = pnand %p1456_p6, %p1450_p3 }
  0x11   :  { %1460 = shalt.err (!%p1457_p7)
}
  0x12   :  { %s1535_s24 = smov 64   ;;  %s1536_s25 = smov 4  }
  0x13   :  { %34 = dma.hbm_to_vmem [thread:$0]  %s1787_s1, 256, %s29_s13, [#allocation6], %s1535_s24, %s1535_s24, %s1536_s25  }
  0x14   :  { %s1461_s30 = scalar_lea.hbm %s1786_s0, 4096 }
  0x15   :  { %p1462_p8 = scmp.ne.s32.totalorder %s1786_s0, %s1461_s30  ;;  %p1465_p9 = scmp.lt.u32.totalorder %s1461_s30, %s1786_s0 }
  0x17   :  { %p1467_p10 = pnand %p1465_p9, %p1462_p8 }
  0x19   :  { %1470 = shalt.err (!%p1467_p10)
}
  0x1a   :  { %s1471_s8 = scalar_lea.vmem %s1560_s15, 4096  ;;  %p1476_p12 = scmp.lt.s32.totalorder %s1560_s15, %s1560_s15 }
  0x1b   :  { %p1472_p11 = scmp.ne.s32.totalorder %s1560_s15, %s1471_s8  ;;  %p1477_p13 = scmp.lt.s32.totalorder %s1471_s8, %s1471_s8 }
  0x1d   :  { %p1478_p0 = por %p1477_p13, %p1476_p12 }
  0x1f   :  { %p1479_p1 = pnand %p1478_p0, %p1472_p11 }
  0x21   :  { %1482 = shalt.err (!%p1479_p1)
}
  0x22   :  { %22 = dma.hbm_to_vmem [thread:$0]  %s1786_s0, 4096, %s1560_s15, [#allocation3], %s1535_s24, %s1535_s24, %s1536_s25  }
  0x23   :  { %s1537_s10 = smov [#allocation7]   ;;  %s1483_s14 = scalar_lea.hbm %s1788_s2, 16 }
  0x24   :  { %s41_s11 = sshll.u32 %s1537_s10, 4  ;;  %p1484_p2 = scmp.ne.s32.totalorder %s1788_s2, %s1483_s14  ;;  %s42_s11 = int_to_ptr.vmem [resolvable:$true] %s41_s11 }
  0x25   :  { %p1487_p3 = scmp.lt.u32.totalorder %s1483_s14, %s1788_s2 }
  0x27   :  { %p1489_p4 = pnand %p1487_p3, %p1484_p2 }
  0x29   :  { %1492 = shalt.err (!%p1489_p4)
}
  0x2a   :  { %s1493_s20 = scalar_lea.vmem %s42_s11, 16  ;;  %s1497_s0 = scalar_lea.vmem %s42_s11, 32 }
  0x2b   :  { %p1494_p5 = scmp.ne.s32.totalorder %s42_s11, %s1493_s20  ;;  %p1498_p6 = scmp.lt.s32.totalorder %s42_s11, %s42_s11 }
  0x2c   :  { %p1499_p7 = scmp.lt.s32.totalorder %s1497_s0, %s1493_s20 }
  0x2e   :  { %p1500_p8 = por %p1499_p7, %p1498_p6 }
  0x30   :  { %p1501_p9 = pnand %p1500_p8, %p1494_p5 }
  0x32   :  { %1504 = shalt.err (!%p1501_p9)
}
  0x33   :  { %44 = dma.hbm_to_vmem [thread:$0]  %s1788_s2, 16, %s42_s11, [#allocation6]  }
  0x34   :  { %1527 = dma.done.wait [#allocation3], 4096  }
  0x35   :  { %1528 = vsyncadd [#allocation3], 4294963200 }
  0x36   :  { %1529 = dma.done.wait [#allocation6], 272  }
  0x37   :  { %1530 = vsyncadd [#allocation6], 4294967024  ;;  %vm398_vm0 = vcmask 1044480   ;;  %vm399_vm1 = vcmask 1045504   ;;  %v1538_v0 = vmov 65535   ;;  %vm301_vm2 = vcmask 220160  }
  0x38   :  { %v400_v1 = vsel %vm398_vm0, 4294967295, %v1538_v0  ;;  %v1405_v2 = vld [vmem:[#allocation5] sm:$0xff]   ;;  %v1406_v4 = vld [vmem:[#allocation5 + $0x8] sm:$0x3f]   ;;  %v1411_v10 = vld [vmem:[#allocation2 + $0x10] sm:$0xff]   ;;  %vm1014_vm3 = vcmask 519168  }
  0x39   :  { %v401_v3 = vsel %vm399_vm1, %v400_v1, 0  ;;  %1326 = vmatprep.subr.bf16.mxu0 %v1405_v2  ;;  %1394 = vmatprep.subr.bf16.mxu1 %v1405_v2  ;;  %v1407_v5 = vld [vmem:[#allocation2] sm:$0xff]   ;;  %v1409_v8 = vld [vmem:[#allocation2 + $0x8] sm:$0xff]   ;;  %v1412_v11 = vld [vmem:[#allocation2 + $0x90] sm:$0xff]   ;;  %s1539_s2 = smov [#allocation8]  }
  0x3a   :  { %1327 = vmatpush3.bf16.msra.mxu0 %v1405_v2  ;;  %1396 = vmatpush3.bf16.msra.mxu1 %v1405_v2  ;;  %v403_v6 = vand.u32 %v1406_v4, %v401_v3  ;;  %v1408_v7 = vld [vmem:[#allocation2 + $0x80] sm:$0xff]   ;;  %v1410_v9 = vld [vmem:[#allocation2 + $0x88] sm:$0xff]   ;;  %v1413_v12 = vld [vmem:[#allocation2 + $0x18] sm:$0xff]   ;;  %s1084_s22 = sshll.u32 %s1539_s2, 4  ;;  %s1085_s22 = int_to_ptr.vmem [resolvable:$true] %s1084_s22 }
  0x3b   :  { %1330 = vmatprep.mubr.msk.bf16.mxu0 %vm301_vm2, %v1407_v5  ;;  %1362 = vmatprep.mubr.msk.bf16.mxu1 %vm301_vm2, %v1408_v7  ;;  %v1414_v13 = vld [vmem:[#allocation2 + $0x98] sm:$0xff]   ;;  %v1415_v14 = vld [vmem:[#allocation2 + $0x20] sm:$0xff]   ;;  %v1417_v16 = vld [vmem:[#allocation2 + $0x28] sm:$0xff]   ;;  %s1505_s23 = scalar_lea.vmem %s1085_s22, 4096  ;;  %p1510_p11 = scmp.lt.s32.totalorder %s1085_s22, %s1085_s22 }
  0x3c   :  { %1328 = vmatprep.subr.bf16.mxu0 %v403_v6  ;;  %1395 = vmatprep.subr.bf16.mxu1 %v403_v6  ;;  %v1416_v15 = vld [vmem:[#allocation2 + $0xa0] sm:$0xff]   ;;  %v1418_v17 = vld [vmem:[#allocation2 + $0xa8] sm:$0xff]   ;;  %v1419_v18 = vld [vmem:[#allocation2 + $0x30] sm:$0xff]   ;;  %p1506_p10 = scmp.ne.s32.totalorder %s1085_s22, %s1505_s23  ;;  %p1511_p12 = scmp.lt.s32.totalorder %s1505_s23, %s1505_s23 }
  0x3d   :  { %v1420_v19 = vld [vmem:[#allocation2 + $0xb0] sm:$0xff]   ;;  %v1421_v20 = vld [vmem:[#allocation2 + $0x38] sm:$0xff]   ;;  %v1423_v22 = vld [vmem:[#allocation2 + $0x40] sm:$0xff]  }
  0x3e   :  { %1329 = vmatpush3.bf16.msra.mxu0 %v403_v6  ;;  %1397 = vmatpush3.bf16.msra.mxu1 %v403_v6  ;;  %v1422_v21 = vld [vmem:[#allocation2 + $0xb8] sm:$0xff]   ;;  %v1424_v23 = vld [vmem:[#allocation2 + $0xc0] sm:$0xff]   ;;  %v1425_v24 = vld [vmem:[#allocation2 + $0x48] sm:$0xff]   ;;  %p1512_p13 = por %p1511_p12, %p1510_p11 }
  0x3f   :  { %v1426_v25 = vld [vmem:[#allocation2 + $0xc8] sm:$0xff]   ;;  %v1427_v26 = vld [vmem:[#allocation2 + $0x50] sm:$0xff]   ;;  %v1429_v28 = vld [vmem:[#allocation2 + $0x58] sm:$0xff]  }
  0x40   :  { %v1428_v27 = vld [vmem:[#allocation2 + $0xd0] sm:$0xff]   ;;  %v1430_v29 = vld [vmem:[#allocation2 + $0xd8] sm:$0xff]   ;;  %v1431_v30 = vld [vmem:[#allocation2 + $0x60] sm:$0xff]   ;;  %p1513_p0 = pnand %p1512_p13, %p1506_p10 }
  0x41   :  { %1331 = vmatmul.mubr.msk.bf16.vlgmr.msra.gmra.mrb[0].mxu0 %vm301_vm2, %v1409_v8  ;;  %1363 = vmatmul.mubr.msk.bf16.vlgmr.msra.gmra.mrb[0].mxu1 %vm301_vm2, %v1410_v9  ;;  %v1432_v31 = vld [vmem:[#allocation2 + $0xe0] sm:$0xff]   ;;  %v1433_v32 = vld [vmem:[#allocation2 + $0x68] sm:$0xff]   ;;  %v1435_v34 = vld [vmem:[#allocation2 + $0x70] sm:$0xff]  }
  0x42   :  { %1334 = vmatprep.mubr.msk.bf16.mxu0 %vm301_vm2, %v1411_v10  ;;  %1366 = vmatprep.mubr.msk.bf16.mxu1 %vm301_vm2, %v1412_v11  ;;  %v1434_v33 = vld [vmem:[#allocation2 + $0xe8] sm:$0xff]   ;;  %v1436_v35 = vld [vmem:[#allocation2 + $0xf0] sm:$0xff]   ;;  %v1437_v36 = vld [vmem:[#allocation2 + $0x78] sm:$0xff]  }
  0x43   :  { %v1438_v37 = vld [vmem:[#allocation2 + $0xf8] sm:$0xff]   ;;  %v1641_v38 = vld [vmem:[#allocation7] ss:$0 sm:$0xff] }
  0x49   :  { %1335 = vmatmul.mubr.msk.bf16.gmra.mrb[4].mxu0 %vm301_vm2, %v1413_v12  ;;  %1367 = vmatmul.mubr.msk.bf16.gmra.mrb[4].mxu1 %vm301_vm2, %v1414_v13 }
  0x4a   :  { %1338 = vmatprep.mubr.msk.bf16.mxu0 %vm301_vm2, %v1415_v14  ;;  %1370 = vmatprep.mubr.msk.bf16.mxu1 %vm301_vm2, %v1416_v15 }
  0x51   :  { %1339 = vmatmul.mubr.msk.bf16.gmra.mrb[8].mxu0 %vm301_vm2, %v1417_v16  ;;  %1371 = vmatmul.mubr.msk.bf16.gmra.mrb[8].mxu1 %vm301_vm2, %v1418_v17 }
  0x52   :  { %1342 = vmatprep.mubr.msk.bf16.mxu0 %vm301_vm2, %v1419_v18  ;;  %1374 = vmatprep.mubr.msk.bf16.mxu1 %vm301_vm2, %v1420_v19 }
  0x59   :  { %1343 = vmatmul.mubr.msk.bf16.gmra.mrb[12].mxu0 %vm301_vm2, %v1421_v20  ;;  %1375 = vmatmul.mubr.msk.bf16.gmra.mrb[12].mxu1 %vm301_vm2, %v1422_v21 }
  0x5a   :  { %1346 = vmatprep.mubr.msk.bf16.mxu0 %vm301_vm2, %v1423_v22  ;;  %1378 = vmatprep.mubr.msk.bf16.mxu1 %vm301_vm2, %v1424_v23 }
  0x61   :  { %1347 = vmatmul.mubr.msk.bf16.gmra.mrb[16].mxu0 %vm301_vm2, %v1425_v24  ;;  %1379 = vmatmul.mubr.msk.bf16.gmra.mrb[16].mxu1 %vm301_vm2, %v1426_v25 }
  0x62   :  { %1350 = vmatprep.mubr.msk.bf16.mxu0 %vm301_vm2, %v1427_v26  ;;  %1382 = vmatprep.mubr.msk.bf16.mxu1 %vm301_vm2, %v1428_v27 }
  0x69   :  { %1351 = vmatmul.mubr.msk.bf16.gmra.mrb[20].mxu0 %vm301_vm2, %v1429_v28  ;;  %1383 = vmatmul.mubr.msk.bf16.gmra.mrb[20].mxu1 %vm301_vm2, %v1430_v29 }
  0x6a   :  { %1354 = vmatprep.mubr.msk.bf16.mxu0 %vm301_vm2, %v1431_v30  ;;  %1386 = vmatprep.mubr.msk.bf16.mxu1 %vm301_vm2, %v1432_v31 }
  0x71   :  { %1355 = vmatmul.mubr.msk.bf16.gmra.mrb[24].mxu0 %vm301_vm2, %v1433_v32  ;;  %1387 = vmatmul.mubr.msk.bf16.gmra.mrb[24].mxu1 %vm301_vm2, %v1434_v33 }
  0x72   :  { %1358 = vmatprep.mubr.msk.bf16.mxu0 %vm301_vm2, %v1435_v34  ;;  %1390 = vmatprep.mubr.msk.bf16.mxu1 %vm301_vm2, %v1436_v35 }
  0x79   :  { %1359 = vmatmul.mubr.msk.bf16.gmra.mrb[28].mxu0 %vm301_vm2, %v1437_v36  ;;  %1391 = vmatmul.mubr.msk.bf16.gmra.mrb[28].mxu1 %vm301_vm2, %v1438_v37 }
 0x114   :  { %v1332_v39 = vpop.f32.mrb[0].mxu0  ;;  %v1364_v40 = vpop.f32.mrb[0].mxu1 }
 0x115   :  { %v448_v41 = vadd.f32 %v1332_v39, %v1641_v38  ;;  %v576_v42 = vadd.f32 %v1364_v40, %v1641_v38  ;;  %v439_v43 = vpop.f32.mrb[1].mxu0  ;;  %v567_v44 = vpop.f32.mrb[1].mxu1 }
 0x116   :  { %v440_v45 = vadd.f32 %v1641_v38, %v439_v43  ;;  %v568_v46 = vadd.f32 %v1641_v38, %v567_v44  ;;  %v1333_v47 = vpop.f32.mrb[2].mxu0  ;;  %v1365_v48 = vpop.f32.mrb[2].mxu1 }
 0x117   :  { %v696_v49 = vmax.f32 %v448_v41, 0.0  ;;  %v728_v50 = vmax.f32 %v576_v42, 0.0  ;;  %v451_v51 = vadd.f32 %v1333_v47, %v1641_v38  ;;  %v579_v52 = vadd.f32 %v1365_v48, %v1641_v38  ;;  %v442_v53 = vpop.f32.mrb[3].mxu0  ;;  %v570_v54 = vpop.f32.mrb[3].mxu1 }
 0x118   :  { %v694_v55 = vmax.f32 %v440_v45, 0.0  ;;  %v726_v56 = vmax.f32 %v568_v46, 0.0  ;;  %v443_v57 = vadd.f32 %v1641_v38, %v442_v53  ;;  %v571_v58 = vadd.f32 %v1641_v38, %v570_v54 }
 0x119   :  { %v1230_v59 = vpack.c.bf16 %v696_v49, %v696_v49  ;;  %v1262_v60 = vpack.c.bf16 %v728_v50, %v728_v50  ;;  %v697_v61 = vmax.f32 %v451_v51, 0.0  ;;  %v729_v62 = vmax.f32 %v579_v52, 0.0 }
 0x11a   :  { %v1228_v63 = vpack.c.bf16 %v694_v55, %v694_v55  ;;  %v1260_v0 = vpack.c.bf16 %v726_v56, %v726_v56  ;;  %v695_v1 = vmax.f32 %v443_v57, 0.0  ;;  %v727_v2 = vmax.f32 %v571_v58, 0.0 }
 0x11b   :  { %1017 = vst.msk [vmem:[#allocation8 + $0x8] sm:$0xf] %vm1014_vm3, %v1230_v59  ;;  %1049 = vst.msk [vmem:[#allocation8 + $0x88] sm:$0xf] %vm1014_vm3, %v1262_v60  ;;  %v1231_v3 = vpack.c.bf16 %v697_v61, %v697_v61  ;;  %v1263_v4 = vpack.c.bf16 %v729_v62, %v729_v62 }
 0x11c   :  { %1015 = vst.msk [vmem:[#allocation8] sm:$0xf] %vm1014_vm3, %v1228_v63  ;;  %1047 = vst.msk [vmem:[#allocation8 + $0x80] sm:$0xf] %vm1014_vm3, %v1260_v0  ;;  %v1229_v5 = vpack.c.bf16 %v695_v1, %v695_v1  ;;  %v1261_v6 = vpack.c.bf16 %v727_v2, %v727_v2  ;;  %v1336_v7 = vpop.f32.mrb[4].mxu0  ;;  %v1368_v8 = vpop.f32.mrb[4].mxu1 }
 0x11d   :  { %1018 = vst.msk [vmem:[#allocation8 + $0xc] sm:$0xf] %vm1014_vm3, %v1231_v3  ;;  %1050 = vst.msk [vmem:[#allocation8 + $0x8c] sm:$0xf] %vm1014_vm3, %v1263_v4  ;;  %v464_v9 = vadd.f32 %v1336_v7, %v1641_v38  ;;  %v592_v10 = vadd.f32 %v1368_v8, %v1641_v38  ;;  %v455_v11 = vpop.f32.mrb[5].mxu0  ;;  %v583_v12 = vpop.f32.mrb[5].mxu1 }
 0x11e   :  { %1016 = vst.msk [vmem:[#allocation8 + $0x4] sm:$0xf] %vm1014_vm3, %v1229_v5  ;;  %1048 = vst.msk [vmem:[#allocation8 + $0x84] sm:$0xf] %vm1014_vm3, %v1261_v6  ;;  %v456_v13 = vadd.f32 %v1641_v38, %v455_v11  ;;  %v584_v14 = vadd.f32 %v1641_v38, %v583_v12  ;;  %v1337_v15 = vpop.f32.mrb[6].mxu0  ;;  %v1369_v16 = vpop.f32.mrb[6].mxu1 }
 0x11f   :  { %v700_v17 = vmax.f32 %v464_v9, 0.0  ;;  %v732_v18 = vmax.f32 %v592_v10, 0.0  ;;  %v467_v19 = vadd.f32 %v1337_v15, %v1641_v38  ;;  %v595_v20 = vadd.f32 %v1369_v16, %v1641_v38  ;;  %v458_v21 = vpop.f32.mrb[7].mxu0  ;;  %v586_v22 = vpop.f32.mrb[7].mxu1 }
 0x120   :  { %v698_v23 = vmax.f32 %v456_v13, 0.0  ;;  %v730_v24 = vmax.f32 %v584_v14, 0.0  ;;  %v459_v25 = vadd.f32 %v1641_v38, %v458_v21  ;;  %v587_v26 = vadd.f32 %v1641_v38, %v586_v22 }
 0x121   :  { %v1234_v27 = vpack.c.bf16 %v700_v17, %v700_v17  ;;  %v1266_v28 = vpack.c.bf16 %v732_v18, %v732_v18  ;;  %v701_v29 = vmax.f32 %v467_v19, 0.0  ;;  %v733_v30 = vmax.f32 %v595_v20, 0.0 }
 0x122   :  { %v1232_v31 = vpack.c.bf16 %v698_v23, %v698_v23  ;;  %v1264_v32 = vpack.c.bf16 %v730_v24, %v730_v24  ;;  %v699_v33 = vmax.f32 %v459_v25, 0.0  ;;  %v731_v34 = vmax.f32 %v587_v26, 0.0 }
 0x123   :  { %1021 = vst.msk [vmem:[#allocation8 + $0x18] sm:$0xf] %vm1014_vm3, %v1234_v27  ;;  %1053 = vst.msk [vmem:[#allocation8 + $0x98] sm:$0xf] %vm1014_vm3, %v1266_v28  ;;  %v1235_v35 = vpack.c.bf16 %v701_v29, %v701_v29  ;;  %v1267_v36 = vpack.c.bf16 %v733_v30, %v733_v30 }
 0x124   :  { %1019 = vst.msk [vmem:[#allocation8 + $0x10] sm:$0xf] %vm1014_vm3, %v1232_v31  ;;  %1051 = vst.msk [vmem:[#allocation8 + $0x90] sm:$0xf] %vm1014_vm3, %v1264_v32  ;;  %v1233_v37 = vpack.c.bf16 %v699_v33, %v699_v33  ;;  %v1265_v39 = vpack.c.bf16 %v731_v34, %v731_v34  ;;  %v1340_v40 = vpop.f32.mrb[8].mxu0  ;;  %v1372_v41 = vpop.f32.mrb[8].mxu1 }
 0x125   :  { %1022 = vst.msk [vmem:[#allocation8 + $0x1c] sm:$0xf] %vm1014_vm3, %v1235_v35  ;;  %1054 = vst.msk [vmem:[#allocation8 + $0x9c] sm:$0xf] %vm1014_vm3, %v1267_v36  ;;  %v480_v42 = vadd.f32 %v1340_v40, %v1641_v38  ;;  %v608_v43 = vadd.f32 %v1372_v41, %v1641_v38  ;;  %v471_v44 = vpop.f32.mrb[9].mxu0  ;;  %v599_v45 = vpop.f32.mrb[9].mxu1 }
 0x126   :  { %1020 = vst.msk [vmem:[#allocation8 + $0x14] sm:$0xf] %vm1014_vm3, %v1233_v37  ;;  %1052 = vst.msk [vmem:[#allocation8 + $0x94] sm:$0xf] %vm1014_vm3, %v1265_v39  ;;  %v472_v46 = vadd.f32 %v1641_v38, %v471_v44  ;;  %v600_v47 = vadd.f32 %v1641_v38, %v599_v45  ;;  %v1341_v48 = vpop.f32.mrb[10].mxu0  ;;  %v1373_v49 = vpop.f32.mrb[10].mxu1 }
 0x127   :  { %v704_v50 = vmax.f32 %v480_v42, 0.0  ;;  %v736_v51 = vmax.f32 %v608_v43, 0.0  ;;  %v483_v52 = vadd.f32 %v1341_v48, %v1641_v38  ;;  %v611_v53 = vadd.f32 %v1373_v49, %v1641_v38  ;;  %v474_v54 = vpop.f32.mrb[11].mxu0  ;;  %v602_v55 = vpop.f32.mrb[11].mxu1 }
 0x128   :  { %v702_v56 = vmax.f32 %v472_v46, 0.0  ;;  %v734_v57 = vmax.f32 %v600_v47, 0.0  ;;  %v475_v58 = vadd.f32 %v1641_v38, %v474_v54  ;;  %v603_v59 = vadd.f32 %v1641_v38, %v602_v55 }
 0x129   :  { %v1238_v60 = vpack.c.bf16 %v704_v50, %v704_v50  ;;  %v1270_v61 = vpack.c.bf16 %v736_v51, %v736_v51  ;;  %v705_v62 = vmax.f32 %v483_v52, 0.0  ;;  %v737_v63 = vmax.f32 %v611_v53, 0.0 }
 0x12a   :  { %v1236_v0 = vpack.c.bf16 %v702_v56, %v702_v56  ;;  %v1268_v1 = vpack.c.bf16 %v734_v57, %v734_v57  ;;  %v703_v2 = vmax.f32 %v475_v58, 0.0  ;;  %v735_v3 = vmax.f32 %v603_v59, 0.0 }
 0x12b   :  { %1025 = vst.msk [vmem:[#allocation8 + $0x28] sm:$0xf] %vm1014_vm3, %v1238_v60  ;;  %1057 = vst.msk [vmem:[#allocation8 + $0xa8] sm:$0xf] %vm1014_vm3, %v1270_v61  ;;  %v1239_v4 = vpack.c.bf16 %v705_v62, %v705_v62  ;;  %v1271_v5 = vpack.c.bf16 %v737_v63, %v737_v63 }
 0x12c   :  { %1023 = vst.msk [vmem:[#allocation8 + $0x20] sm:$0xf] %vm1014_vm3, %v1236_v0  ;;  %1055 = vst.msk [vmem:[#allocation8 + $0xa0] sm:$0xf] %vm1014_vm3, %v1268_v1  ;;  %v1237_v6 = vpack.c.bf16 %v703_v2, %v703_v2  ;;  %v1269_v7 = vpack.c.bf16 %v735_v3, %v735_v3  ;;  %v1344_v8 = vpop.f32.mrb[12].mxu0  ;;  %v1376_v9 = vpop.f32.mrb[12].mxu1 }
 0x12d   :  { %1026 = vst.msk [vmem:[#allocation8 + $0x2c] sm:$0xf] %vm1014_vm3, %v1239_v4  ;;  %1058 = vst.msk [vmem:[#allocation8 + $0xac] sm:$0xf] %vm1014_vm3, %v1271_v5  ;;  %v496_v10 = vadd.f32 %v1344_v8, %v1641_v38  ;;  %v624_v11 = vadd.f32 %v1376_v9, %v1641_v38  ;;  %v487_v12 = vpop.f32.mrb[13].mxu0  ;;  %v615_v13 = vpop.f32.mrb[13].mxu1 }
 0x12e   :  { %1024 = vst.msk [vmem:[#allocation8 + $0x24] sm:$0xf] %vm1014_vm3, %v1237_v6  ;;  %1056 = vst.msk [vmem:[#allocation8 + $0xa4] sm:$0xf] %vm1014_vm3, %v1269_v7  ;;  %v488_v14 = vadd.f32 %v1641_v38, %v487_v12  ;;  %v616_v15 = vadd.f32 %v1641_v38, %v615_v13  ;;  %v1345_v16 = vpop.f32.mrb[14].mxu0  ;;  %v1377_v17 = vpop.f32.mrb[14].mxu1 }
 0x12f   :  { %v708_v18 = vmax.f32 %v496_v10, 0.0  ;;  %v740_v19 = vmax.f32 %v624_v11, 0.0  ;;  %v499_v20 = vadd.f32 %v1345_v16, %v1641_v38  ;;  %v627_v21 = vadd.f32 %v1377_v17, %v1641_v38  ;;  %v490_v22 = vpop.f32.mrb[15].mxu0  ;;  %v618_v23 = vpop.f32.mrb[15].mxu1 }
 0x130   :  { %v706_v24 = vmax.f32 %v488_v14, 0.0  ;;  %v738_v25 = vmax.f32 %v616_v15, 0.0  ;;  %v491_v26 = vadd.f32 %v1641_v38, %v490_v22  ;;  %v619_v27 = vadd.f32 %v1641_v38, %v618_v23 }
 0x131   :  { %v1242_v28 = vpack.c.bf16 %v708_v18, %v708_v18  ;;  %v1274_v29 = vpack.c.bf16 %v740_v19, %v740_v19  ;;  %v709_v30 = vmax.f32 %v499_v20, 0.0  ;;  %v741_v31 = vmax.f32 %v627_v21, 0.0 }
 0x132   :  { %v1240_v32 = vpack.c.bf16 %v706_v24, %v706_v24  ;;  %v1272_v33 = vpack.c.bf16 %v738_v25, %v738_v25  ;;  %v707_v34 = vmax.f32 %v491_v26, 0.0  ;;  %v739_v35 = vmax.f32 %v619_v27, 0.0 }
 0x133   :  { %1029 = vst.msk [vmem:[#allocation8 + $0x38] sm:$0xf] %vm1014_vm3, %v1242_v28  ;;  %1061 = vst.msk [vmem:[#allocation8 + $0xb8] sm:$0xf] %vm1014_vm3, %v1274_v29  ;;  %v1243_v36 = vpack.c.bf16 %v709_v30, %v709_v30  ;;  %v1275_v37 = vpack.c.bf16 %v741_v31, %v741_v31 }
 0x134   :  { %1027 = vst.msk [vmem:[#allocation8 + $0x30] sm:$0xf] %vm1014_vm3, %v1240_v32  ;;  %1059 = vst.msk [vmem:[#allocation8 + $0xb0] sm:$0xf] %vm1014_vm3, %v1272_v33  ;;  %v1241_v39 = vpack.c.bf16 %v707_v34, %v707_v34  ;;  %v1273_v40 = vpack.c.bf16 %v739_v35, %v739_v35  ;;  %v1348_v41 = vpop.f32.mrb[16].mxu0  ;;  %v1380_v42 = vpop.f32.mrb[16].mxu1 }
 0x135   :  { %1030 = vst.msk [vmem:[#allocation8 + $0x3c] sm:$0xf] %vm1014_vm3, %v1243_v36  ;;  %1062 = vst.msk [vmem:[#allocation8 + $0xbc] sm:$0xf] %vm1014_vm3, %v1275_v37  ;;  %v512_v43 = vadd.f32 %v1348_v41, %v1641_v38  ;;  %v640_v44 = vadd.f32 %v1380_v42, %v1641_v38  ;;  %v503_v45 = vpop.f32.mrb[17].mxu0  ;;  %v631_v46 = vpop.f32.mrb[17].mxu1 }
 0x136   :  { %1028 = vst.msk [vmem:[#allocation8 + $0x34] sm:$0xf] %vm1014_vm3, %v1241_v39  ;;  %1060 = vst.msk [vmem:[#allocation8 + $0xb4] sm:$0xf] %vm1014_vm3, %v1273_v40  ;;  %v504_v47 = vadd.f32 %v1641_v38, %v503_v45  ;;  %v632_v48 = vadd.f32 %v1641_v38, %v631_v46  ;;  %v1349_v49 = vpop.f32.mrb[18].mxu0  ;;  %v1381_v50 = vpop.f32.mrb[18].mxu1 }
 0x137   :  { %v712_v51 = vmax.f32 %v512_v43, 0.0  ;;  %v744_v52 = vmax.f32 %v640_v44, 0.0  ;;  %v515_v53 = vadd.f32 %v1349_v49, %v1641_v38  ;;  %v643_v54 = vadd.f32 %v1381_v50, %v1641_v38  ;;  %v506_v55 = vpop.f32.mrb[19].mxu0  ;;  %v634_v56 = vpop.f32.mrb[19].mxu1 }
 0x138   :  { %v710_v57 = vmax.f32 %v504_v47, 0.0  ;;  %v742_v58 = vmax.f32 %v632_v48, 0.0  ;;  %v507_v59 = vadd.f32 %v1641_v38, %v506_v55  ;;  %v635_v60 = vadd.f32 %v1641_v38, %v634_v56 }
 0x139   :  { %v1246_v61 = vpack.c.bf16 %v712_v51, %v712_v51  ;;  %v1278_v62 = vpack.c.bf16 %v744_v52, %v744_v52  ;;  %v713_v63 = vmax.f32 %v515_v53, 0.0  ;;  %v745_v0 = vmax.f32 %v643_v54, 0.0 }
 0x13a   :  { %v1244_v1 = vpack.c.bf16 %v710_v57, %v710_v57  ;;  %v1276_v2 = vpack.c.bf16 %v742_v58, %v742_v58  ;;  %v711_v3 = vmax.f32 %v507_v59, 0.0  ;;  %v743_v4 = vmax.f32 %v635_v60, 0.0 }
 0x13b   :  { %1033 = vst.msk [vmem:[#allocation8 + $0x48] sm:$0xf] %vm1014_vm3, %v1246_v61  ;;  %1065 = vst.msk [vmem:[#allocation8 + $0xc8] sm:$0xf] %vm1014_vm3, %v1278_v62  ;;  %v1247_v5 = vpack.c.bf16 %v713_v63, %v713_v63  ;;  %v1279_v6 = vpack.c.bf16 %v745_v0, %v745_v0 }
 0x13c   :  { %1031 = vst.msk [vmem:[#allocation8 + $0x40] sm:$0xf] %vm1014_vm3, %v1244_v1  ;;  %1063 = vst.msk [vmem:[#allocation8 + $0xc0] sm:$0xf] %vm1014_vm3, %v1276_v2  ;;  %v1245_v7 = vpack.c.bf16 %v711_v3, %v711_v3  ;;  %v1277_v8 = vpack.c.bf16 %v743_v4, %v743_v4  ;;  %v1352_v9 = vpop.f32.mrb[20].mxu0  ;;  %v1384_v10 = vpop.f32.mrb[20].mxu1 }
 0x13d   :  { %1034 = vst.msk [vmem:[#allocation8 + $0x4c] sm:$0xf] %vm1014_vm3, %v1247_v5  ;;  %1066 = vst.msk [vmem:[#allocation8 + $0xcc] sm:$0xf] %vm1014_vm3, %v1279_v6  ;;  %v528_v11 = vadd.f32 %v1352_v9, %v1641_v38  ;;  %v656_v12 = vadd.f32 %v1384_v10, %v1641_v38  ;;  %v519_v13 = vpop.f32.mrb[21].mxu0  ;;  %v647_v14 = vpop.f32.mrb[21].mxu1 }
 0x13e   :  { %1032 = vst.msk [vmem:[#allocation8 + $0x44] sm:$0xf] %vm1014_vm3, %v1245_v7  ;;  %1064 = vst.msk [vmem:[#allocation8 + $0xc4] sm:$0xf] %vm1014_vm3, %v1277_v8  ;;  %v520_v15 = vadd.f32 %v1641_v38, %v519_v13  ;;  %v648_v16 = vadd.f32 %v1641_v38, %v647_v14  ;;  %v1353_v17 = vpop.f32.mrb[22].mxu0  ;;  %v1385_v18 = vpop.f32.mrb[22].mxu1 }
 0x13f   :  { %v716_v19 = vmax.f32 %v528_v11, 0.0  ;;  %v748_v20 = vmax.f32 %v656_v12, 0.0  ;;  %v531_v21 = vadd.f32 %v1353_v17, %v1641_v38  ;;  %v659_v22 = vadd.f32 %v1385_v18, %v1641_v38  ;;  %v522_v23 = vpop.f32.mrb[23].mxu0  ;;  %v650_v24 = vpop.f32.mrb[23].mxu1 }
 0x140   :  { %v714_v25 = vmax.f32 %v520_v15, 0.0  ;;  %v746_v26 = vmax.f32 %v648_v16, 0.0  ;;  %v523_v27 = vadd.f32 %v1641_v38, %v522_v23  ;;  %v651_v28 = vadd.f32 %v1641_v38, %v650_v24 }
 0x141   :  { %v1250_v29 = vpack.c.bf16 %v716_v19, %v716_v19  ;;  %v1282_v30 = vpack.c.bf16 %v748_v20, %v748_v20  ;;  %v717_v31 = vmax.f32 %v531_v21, 0.0  ;;  %v749_v32 = vmax.f32 %v659_v22, 0.0 }
 0x142   :  { %v1248_v33 = vpack.c.bf16 %v714_v25, %v714_v25  ;;  %v1280_v34 = vpack.c.bf16 %v746_v26, %v746_v26  ;;  %v715_v35 = vmax.f32 %v523_v27, 0.0  ;;  %v747_v36 = vmax.f32 %v651_v28, 0.0 }
 0x143   :  { %1037 = vst.msk [vmem:[#allocation8 + $0x58] sm:$0xf] %vm1014_vm3, %v1250_v29  ;;  %1069 = vst.msk [vmem:[#allocation8 + $0xd8] sm:$0xf] %vm1014_vm3, %v1282_v30  ;;  %v1251_v37 = vpack.c.bf16 %v717_v31, %v717_v31  ;;  %v1283_v39 = vpack.c.bf16 %v749_v32, %v749_v32 }
 0x144   :  { %1035 = vst.msk [vmem:[#allocation8 + $0x50] sm:$0xf] %vm1014_vm3, %v1248_v33  ;;  %1067 = vst.msk [vmem:[#allocation8 + $0xd0] sm:$0xf] %vm1014_vm3, %v1280_v34  ;;  %v1249_v40 = vpack.c.bf16 %v715_v35, %v715_v35  ;;  %v1281_v41 = vpack.c.bf16 %v747_v36, %v747_v36  ;;  %v1356_v42 = vpop.f32.mrb[24].mxu0  ;;  %v1388_v43 = vpop.f32.mrb[24].mxu1 }
 0x145   :  { %1038 = vst.msk [vmem:[#allocation8 + $0x5c] sm:$0xf] %vm1014_vm3, %v1251_v37  ;;  %1070 = vst.msk [vmem:[#allocation8 + $0xdc] sm:$0xf] %vm1014_vm3, %v1283_v39  ;;  %v544_v44 = vadd.f32 %v1356_v42, %v1641_v38  ;;  %v672_v45 = vadd.f32 %v1388_v43, %v1641_v38  ;;  %v535_v46 = vpop.f32.mrb[25].mxu0  ;;  %v663_v47 = vpop.f32.mrb[25].mxu1 }
 0x146   :  { %1036 = vst.msk [vmem:[#allocation8 + $0x54] sm:$0xf] %vm1014_vm3, %v1249_v40  ;;  %1068 = vst.msk [vmem:[#allocation8 + $0xd4] sm:$0xf] %vm1014_vm3, %v1281_v41  ;;  %v536_v48 = vadd.f32 %v1641_v38, %v535_v46  ;;  %v664_v49 = vadd.f32 %v1641_v38, %v663_v47  ;;  %v1357_v50 = vpop.f32.mrb[26].mxu0  ;;  %v1389_v51 = vpop.f32.mrb[26].mxu1 }
 0x147   :  { %v720_v52 = vmax.f32 %v544_v44, 0.0  ;;  %v752_v53 = vmax.f32 %v672_v45, 0.0  ;;  %v547_v54 = vadd.f32 %v1357_v50, %v1641_v38  ;;  %v675_v55 = vadd.f32 %v1389_v51, %v1641_v38  ;;  %v538_v56 = vpop.f32.mrb[27].mxu0  ;;  %v666_v57 = vpop.f32.mrb[27].mxu1 }
 0x148   :  { %v718_v58 = vmax.f32 %v536_v48, 0.0  ;;  %v750_v59 = vmax.f32 %v664_v49, 0.0  ;;  %v539_v60 = vadd.f32 %v1641_v38, %v538_v56  ;;  %v667_v61 = vadd.f32 %v1641_v38, %v666_v57 }
 0x149   :  { %v1254_v62 = vpack.c.bf16 %v720_v52, %v720_v52  ;;  %v1286_v63 = vpack.c.bf16 %v752_v53, %v752_v53  ;;  %v721_v0 = vmax.f32 %v547_v54, 0.0  ;;  %v753_v1 = vmax.f32 %v675_v55, 0.0 }
 0x14a   :  { %v1252_v2 = vpack.c.bf16 %v718_v58, %v718_v58  ;;  %v1284_v3 = vpack.c.bf16 %v750_v59, %v750_v59  ;;  %v719_v4 = vmax.f32 %v539_v60, 0.0  ;;  %v751_v5 = vmax.f32 %v667_v61, 0.0 }
 0x14b   :  { %1041 = vst.msk [vmem:[#allocation8 + $0x68] sm:$0xf] %vm1014_vm3, %v1254_v62  ;;  %1073 = vst.msk [vmem:[#allocation8 + $0xe8] sm:$0xf] %vm1014_vm3, %v1286_v63  ;;  %v1255_v6 = vpack.c.bf16 %v721_v0, %v721_v0  ;;  %v1287_v7 = vpack.c.bf16 %v753_v1, %v753_v1 }
 0x14c   :  { %1039 = vst.msk [vmem:[#allocation8 + $0x60] sm:$0xf] %vm1014_vm3, %v1252_v2  ;;  %1071 = vst.msk [vmem:[#allocation8 + $0xe0] sm:$0xf] %vm1014_vm3, %v1284_v3  ;;  %v1253_v8 = vpack.c.bf16 %v719_v4, %v719_v4  ;;  %v1285_v9 = vpack.c.bf16 %v751_v5, %v751_v5  ;;  %v1360_v10 = vpop.f32.mrb[28].mxu0  ;;  %v1392_v11 = vpop.f32.mrb[28].mxu1 }
 0x14d   :  { %1042 = vst.msk [vmem:[#allocation8 + $0x6c] sm:$0xf] %vm1014_vm3, %v1255_v6  ;;  %1074 = vst.msk [vmem:[#allocation8 + $0xec] sm:$0xf] %vm1014_vm3, %v1287_v7  ;;  %v560_v12 = vadd.f32 %v1360_v10, %v1641_v38  ;;  %v688_v13 = vadd.f32 %v1392_v11, %v1641_v38  ;;  %v551_v14 = vpop.f32.mrb[29].mxu0  ;;  %v679_v15 = vpop.f32.mrb[29].mxu1 }
 0x14e   :  { %1040 = vst.msk [vmem:[#allocation8 + $0x64] sm:$0xf] %vm1014_vm3, %v1253_v8  ;;  %1072 = vst.msk [vmem:[#allocation8 + $0xe4] sm:$0xf] %vm1014_vm3, %v1285_v9  ;;  %v552_v16 = vadd.f32 %v1641_v38, %v551_v14  ;;  %v680_v17 = vadd.f32 %v1641_v38, %v679_v15  ;;  %v1361_v18 = vpop.f32.mrb[30].mxu0  ;;  %v1393_v19 = vpop.f32.mrb[30].mxu1 }
 0x14f   :  { %v724_v20 = vmax.f32 %v560_v12, 0.0  ;;  %v756_v21 = vmax.f32 %v688_v13, 0.0  ;;  %v563_v22 = vadd.f32 %v1361_v18, %v1641_v38  ;;  %v691_v23 = vadd.f32 %v1393_v19, %v1641_v38  ;;  %v554_v24 = vpop.f32.mrb[31].mxu0  ;;  %v682_v25 = vpop.f32.mrb[31].mxu1 }
 0x150   :  { %v722_v26 = vmax.f32 %v552_v16, 0.0  ;;  %v754_v27 = vmax.f32 %v680_v17, 0.0  ;;  %v555_v28 = vadd.f32 %v1641_v38, %v554_v24  ;;  %v683_v29 = vadd.f32 %v1641_v38, %v682_v25 }
 0x151   :  { %v1258_v30 = vpack.c.bf16 %v724_v20, %v724_v20  ;;  %v1290_v31 = vpack.c.bf16 %v756_v21, %v756_v21  ;;  %v725_v32 = vmax.f32 %v563_v22, 0.0  ;;  %v757_v33 = vmax.f32 %v691_v23, 0.0 }
 0x152   :  { %v1256_v34 = vpack.c.bf16 %v722_v26, %v722_v26  ;;  %v1288_v35 = vpack.c.bf16 %v754_v27, %v754_v27  ;;  %v723_v36 = vmax.f32 %v555_v28, 0.0  ;;  %v755_v37 = vmax.f32 %v683_v29, 0.0 }
 0x153   :  { %1045 = vst.msk [vmem:[#allocation8 + $0x78] sm:$0xf] %vm1014_vm3, %v1258_v30  ;;  %1077 = vst.msk [vmem:[#allocation8 + $0xf8] sm:$0xf] %vm1014_vm3, %v1290_v31  ;;  %v1259_v39 = vpack.c.bf16 %v725_v32, %v725_v32  ;;  %v1291_v40 = vpack.c.bf16 %v757_v33, %v757_v33 }
 0x154   :  { %1043 = vst.msk [vmem:[#allocation8 + $0x70] sm:$0xf] %vm1014_vm3, %v1256_v34  ;;  %1075 = vst.msk [vmem:[#allocation8 + $0xf0] sm:$0xf] %vm1014_vm3, %v1288_v35  ;;  %v1257_v38 = vpack.c.bf16 %v723_v36, %v723_v36  ;;  %v1289_v41 = vpack.c.bf16 %v755_v37, %v755_v37 }
 0x155   :  { %1046 = vst.msk [vmem:[#allocation8 + $0x7c] sm:$0xf] %vm1014_vm3, %v1259_v39  ;;  %1078 = vst.msk [vmem:[#allocation8 + $0xfc] sm:$0xf] %vm1014_vm3, %v1291_v40 }
 0x156   :  { %1044 = vst.msk [vmem:[#allocation8 + $0x74] sm:$0xf] %vm1014_vm3, %v1257_v38  ;;  %1076 = vst.msk [vmem:[#allocation8 + $0xf4] sm:$0xf] %vm1014_vm3, %v1289_v41 }
 0x157   :  { %1516 = shalt.err (!%p1513_p0)
}
 0x158   :  { %s1517_s28 = scalar_lea.hbm %s1789_s3, 4096 }
 0x159   :  { %p1518_p1 = scmp.ne.s32.totalorder %s1789_s3, %s1517_s28  ;;  %p1521_p2 = scmp.lt.u32.totalorder %s1517_s28, %s1789_s3 }
 0x15b   :  { %p1523_p3 = pnand %p1521_p2, %p1518_p1 }
 0x15d   :  { %1526 = shalt.err (!%p1523_p3)
}
 0x15e   :  { %1090 = dma.vmem_to_hbm [thread:$0]  %s1085_s22, 4096, %s1789_s3, [#allocation4], %s1535_s24, %s1535_s24, %s1536_s25  }
 0x15f   :  { %1531 = dma.done.wait [#allocation4], 4096  }
 0x160   :  { %1532 = vsyncadd [#allocation4], 4294963200 }
 0x161   :  { %1094 = vsyncpa [#allocation3], 1 }
 0x162   :  { %1095 = vsyncpa [#allocation6], 1 }
 0x163   :  { %1096 = vsyncpa [#allocation4], 1 }

</bundles_post_ra>
